<compile_context>
chip_gen: v6e
topology: v6e:2x2x1
jax: 0.10.0
libtpu: 0.0.40
codegen_flags: <defaults>
</compile_context>

<pallas_src>
import functools

import numpy as np
import jax
import jax.numpy as jnp
from jax import lax
from jax.experimental import pallas as pl
from jax.experimental.pallas import tpu as pltpu

_VMEM_LIMIT = 48 * 1024 * 1024


def _round_up(x, m):
    return (x + m - 1) // m * m


# ----------------------------------------------------------------------------
# Pallas kernel 1: fused matmul + folded-BN + ReLU
# ----------------------------------------------------------------------------

def _matmul_bn_relu_kernel(x_ref, w_ref, scale_ref, shift_ref, o_ref, acc_ref):
    """acc += x @ w ; on last k-step: o = relu(acc * scale + shift)."""
    @pl.when(pl.program_id(2) == 0)
    def _():
        acc_ref[...] = jnp.zeros_like(acc_ref)

    acc_ref[...] += jnp.dot(x_ref[...], w_ref[...],
                            preferred_element_type=jnp.float32)

    @pl.when(pl.program_id(2) == pl.num_programs(2) - 1)
    def _():
        y = acc_ref[...] * scale_ref[...] + shift_ref[...]
        o_ref[...] = jnp.maximum(y, 0.0).astype(o_ref.dtype)


@functools.partial(jax.jit, static_argnums=(4,))
def _fused_matmul_bn_relu(x, w2p, scale_p, shift_p, n_out):
    """relu((x @ w) * scale + shift) -> bf16.

    x: (M, K) float; w2p: (Kp, Np) bf16, pre-padded; scale/shift: (1, Np) f32.
    """
    M, K = x.shape
    Kp, Np = w2p.shape
    TM = min(512, _round_up(M, 8))
    TK = min(512, Kp)          # Kp is always a multiple of min(512, Kp)
    TN = min(256, Np)          # Np is always a multiple of min(256, Np)
    Mp = _round_up(M, TM)
    xp = jnp.pad(x, ((0, Mp - M), (0, Kp - K))).astype(jnp.bfloat16)

    out = pl.pallas_call(
        _matmul_bn_relu_kernel,
        out_shape=jax.ShapeDtypeStruct((Mp, Np), jnp.bfloat16),
        grid_spec=pltpu.PrefetchScalarGridSpec(
            num_scalar_prefetch=0,
            grid=(Mp // TM, Np // TN, Kp // TK),
            in_specs=[
                pl.BlockSpec((TM, TK), lambda i, j, k: (i, k)),
                pl.BlockSpec((TK, TN), lambda i, j, k: (k, j)),
                pl.BlockSpec((1, TN), lambda i, j, k: (0, j)),
                pl.BlockSpec((1, TN), lambda i, j, k: (0, j)),
            ],
            out_specs=pl.BlockSpec((TM, TN), lambda i, j, k: (i, j)),
            scratch_shapes=[pltpu.VMEM((TM, TN), jnp.float32)],
        ),
        compiler_params=pltpu.CompilerParams(
            dimension_semantics=("parallel", "parallel", "arbitrary"),
            vmem_limit_bytes=_VMEM_LIMIT),
    )(xp, w2p, scale_p, shift_p)
    return out[:M, :n_out]


# ----------------------------------------------------------------------------
# Pallas kernel 2: stride-1 1-D sliding-window max (used for separable pooling)
# ----------------------------------------------------------------------------

def _pool1d_s1_kernel(k, x_ref, o_ref):
    """o[r, j, c] = max_{d<k} x[r, j + d, c]  (stride-1 windows)."""
    lo = o_ref.shape[1]
    acc = x_ref[:, 0:lo, :]
    for d in range(1, k):
        acc = jnp.maximum(acc, x_ref[:, d:d + lo, :])
    o_ref[...] = acc


@functools.partial(jax.jit, static_argnums=(1,))
def _pallas_pool1d_s1(x3, k):
    """x3: (R, Lp, Cm) -> (R, Lp - k + 1, Cm) stride-1 window max."""
    R, Lp, Cm = x3.shape
    Lo = Lp - k + 1
    TC = Cm
    if Cm % 128 == 0:
        for cand in (2048, 1024, 512, 256, 128):
            if Cm % cand == 0:
                TC = min(Cm, cand)
                break
    itemsize = jnp.dtype(x3.dtype).itemsize
    row_bytes = max(Lp * TC * itemsize, 1)
    TR = max(1, min(R, (2 * 1024 * 1024) // row_bytes))
    Rp = _round_up(R, TR)
    neg = float(jnp.finfo(x3.dtype).min)
    xpad = jnp.pad(x3, ((0, Rp - R), (0, 0), (0, 0)), constant_values=neg)

    out = pl.pallas_call(
        functools.partial(_pool1d_s1_kernel, k),
        out_shape=jax.ShapeDtypeStruct((Rp, Lo, Cm), x3.dtype),
        grid_spec=pltpu.PrefetchScalarGridSpec(
            num_scalar_prefetch=0,
            grid=(Rp // TR, Cm // TC),
            in_specs=[pl.BlockSpec((TR, Lp, TC), lambda i, j: (i, 0, j))],
            out_specs=pl.BlockSpec((TR, Lo, TC), lambda i, j: (i, 0, j)),
        ),
        compiler_params=pltpu.CompilerParams(
            dimension_semantics=("parallel", "parallel"),
            vmem_limit_bytes=_VMEM_LIMIT),
    )(xpad)
    return out[:R]


# ----------------------------------------------------------------------------
# Conv / pool wrappers
# ----------------------------------------------------------------------------

def conv3d_bn_relu(x, p, *, stride, padding):
    """x: (B,T,H,W,Cin) bf16; p: prepped conv params (see _prep_conv)."""
    B, T, H, W, Cin = x.shape
    kt, kh, kw = p["ksize"]
    st, sh, sw = stride
    pt, ph, pw = padding
    To = (T + 2 * pt - kt) // st + 1
    Ho = (H + 2 * ph - kh) // sh + 1
    Wo = (W + 2 * pw - kw) // sw + 1

    if (kt, kh, kw) == (1, 1, 1) and stride == (1, 1, 1) and padding == (0, 0, 0):
        col = x.reshape(B * T * H * W, Cin)
    else:
        # TODO(synk): direct halo-window conv kernel would avoid this k-fold
        # im2col materialization.
        xp = jnp.pad(x, ((0, 0), (pt, pt), (ph, ph), (pw, pw), (0, 0)))
        patches = []
        for dt in range(kt):
            for dh in range(kh):
                for dw in range(kw):
                    patches.append(xp[:, dt:dt + st * To:st,
                                      dh:dh + sh * Ho:sh,
                                      dw:dw + sw * Wo:sw, :])
        col = jnp.concatenate(patches, axis=-1) if len(patches) > 1 else patches[0]
        col = col.reshape(B * To * Ho * Wo, kt * kh * kw * Cin)

    out = _fused_matmul_bn_relu(col, p["w2"], p["scale"], p["shift"], p["N"])
    return out.reshape(B, To, Ho, Wo, p["N"])


def _maxpool_axis(x, axis, k, s, p):
    """1-D max pool along `axis` of a (B,T,H,W,C) tensor (pad value -inf)."""
    shape = x.shape
    L = shape[axis]
    Lo = (L + 2 * p - k) // s + 1
    Lneed = s * (Lo - 1) + k
    neg = float(jnp.finfo(x.dtype).min)

    pads = [(0, 0)] * x.ndim
    pads[axis] = (p, max(Lneed - L - p, 0))
    xp = jnp.pad(x, pads, constant_values=neg)
    if xp.shape[axis] > Lneed:
        xp = lax.slice_in_dim(xp, 0, Lneed, axis=axis)

    R = int(np.prod(shape[:axis]))
    Cm = int(np.prod(shape[axis + 1:]))
    x3 = xp.reshape(R, Lneed, Cm)

    out = _pallas_pool1d_s1(x3, k)       # (R, s*(Lo-1)+1, Cm)
    if s > 1:
        out = out[:, ::s, :]             # subsample stride-1 result -> stride s
    new_shape = list(shape)
    new_shape[axis] = Lo
    return out.reshape(new_shape)


def maxpool3d(x, *, kernel, stride, padding):
    """Separable 3-D max pool (max is separable; -inf padding per axis)."""
    for axis, k, s, p in ((3, kernel[2], stride[2], padding[2]),
                          (2, kernel[1], stride[1], padding[1]),
                          (1, kernel[0], stride[0], padding[0])):
        if k == 1 and s == 1 and p == 0:
            continue
        x = _maxpool_axis(x, axis, k, s, p)
    return x


# ----------------------------------------------------------------------------
# Parameters (deterministic synthetic init; BN folded; weights prepped once)
# ----------------------------------------------------------------------------

def _init_conv_bn_raw(key, cin, cout, ksize):
    kw_, kg, kb, km, kv = jax.random.split(key, 5)
    fan_in = cin * ksize[0] * ksize[1] * ksize[2]
    w = jax.random.normal(kw_, (cout, cin) + ksize, jnp.float32) * (2.0 / fan_in) ** 0.5
    gamma = 1.0 + 0.1 * jax.random.normal(kg, (cout,), jnp.float32)
    beta = 0.05 * jax.random.normal(kb, (cout,), jnp.float32)
    mean = 0.05 * jax.random.normal(km, (cout,), jnp.float32)
    var = 1.0 + 0.1 * jax.random.uniform(kv, (cout,), jnp.float32)
    eps = 1e-3  # matches nn.BatchNorm3d(eps=0.001)
    scale = gamma / jnp.sqrt(var + eps)
    shift = beta - mean * scale
    return {"w": w, "scale": scale, "shift": shift}


def _prep_conv(raw):
    """Pre-transpose / pre-pad / pre-cast one conv+BN for the Pallas matmul."""
    w = raw["w"]
    cout, cin, kt, kh, kw = w.shape
    K = cin * kt * kh * kw
    w2 = jnp.transpose(w, (2, 3, 4, 1, 0)).reshape(K, cout)
    TK = min(512, _round_up(K, 128))
    TN = min(256, _round_up(cout, 128))
    Kp, Np = _round_up(K, TK), _round_up(cout, TN)
    return {
        "w2": jnp.pad(w2, ((0, Kp - K), (0, Np - cout))).astype(jnp.bfloat16),
        "scale": jnp.pad(raw["scale"], (0, Np - cout)).reshape(1, Np).astype(jnp.float32),
        "shift": jnp.pad(raw["shift"], (0, Np - cout)).reshape(1, Np).astype(jnp.float32),
        "ksize": (kt, kh, kw),
        "N": int(cout),
    }


def _init_sep_raw(key, cin, cout, k):
    k1, k2 = jax.random.split(key)
    return {"s": _init_conv_bn_raw(k1, cin, cout, (1, k, k)),
            "t": _init_conv_bn_raw(k2, cout, cout, (k, 1, 1))}


def _prep_sep(raw):
    return {"s": _prep_conv(raw["s"]), "t": _prep_conv(raw["t"])}


def _init_mixed(key, cin, b0, b1, b2, b3):
    ks = jax.random.split(key, 6)
    r0 = _init_conv_bn_raw(ks[0], cin, b0, (1, 1, 1))
    r10 = _init_conv_bn_raw(ks[1], cin, b1[0], (1, 1, 1))
    r11 = _init_sep_raw(ks[2], b1[0], b1[1], 3)
    r20 = _init_conv_bn_raw(ks[3], cin, b2[0], (1, 1, 1))
    r21 = _init_sep_raw(ks[4], b2[0], b2[1], 3)
    r3 = _init_conv_bn_raw(ks[5], cin, b3, (1, 1, 1))
    # Fuse the three 1x1x1 branch convs (same input) into one wide matmul.
    stem_raw = {
        "w": jnp.concatenate([r0["w"], r10["w"], r20["w"]], axis=0),
        "scale": jnp.concatenate([r0["scale"], r10["scale"], r20["scale"]]),
        "shift": jnp.concatenate([r0["shift"], r10["shift"], r20["shift"]]),
    }
    return {
        "stem": _prep_conv(stem_raw),
        "stem_splits": (int(b0), int(b1[0]), int(b2[0])),
        "b1_1": _prep_sep(r11),
        "b2_1": _prep_sep(r21),
        "b3": _prep_conv(r3),
    }


_MIXED_CFG = {
    "m3b": (192, 64, (96, 128), (16, 32), 32),
    "m3c": (256, 128, (128, 192), (32, 96), 64),
    "m4b": (480, 192, (96, 208), (16, 48), 64),
    "m4c": (512, 160, (112, 224), (24, 64), 64),
    "m4d": (512, 128, (128, 256), (24, 64), 64),
    "m4e": (512, 112, (144, 288), (32, 64), 64),
    "m4f": (528, 256, (160, 320), (32, 128), 128),
    "m5b": (832, 256, (160, 320), (32, 128), 128),
    "m5c": (832, 384, (192, 384), (48, 128), 128),
}


def init_params(key):
    keys = jax.random.split(key, 3 + len(_MIXED_CFG))
    params = {
        "base_sep1": _prep_sep(_init_sep_raw(keys[0], 3, 64, 7)),
        "base_basic": _prep_conv(_init_conv_bn_raw(keys[1], 64, 64, (1, 1, 1))),
        "base_sep2": _prep_sep(_init_sep_raw(keys[2], 64, 192, 3)),
    }
    for i, (name, cfg) in enumerate(_MIXED_CFG.items()):
        params[name] = _init_mixed(keys[3 + i], *cfg)
    # TODO(synk): self.fc (1024->classes_num conv) is dead code w.r.t. the
    # value returned by forward (clipwise_output) and is not instantiated.
    return params


# ----------------------------------------------------------------------------
# Model forward
# ----------------------------------------------------------------------------

def basic_forward(p, x):
    return conv3d_bn_relu(x, p, stride=(1, 1, 1), padding=(0, 0, 0))


def sep_forward(p, x, stride, padding):
    x = conv3d_bn_relu(x, p["s"], stride=(1, stride, stride),
                       padding=(0, padding, padding))
    x = conv3d_bn_relu(x, p["t"], stride=(stride, 1, 1),
                       padding=(padding, 0, 0))
    return x


def mixed_forward(p, x):
    stem = conv3d_bn_relu(x, p["stem"], stride=(1, 1, 1), padding=(0, 0, 0))
    c0, c1, c2 = p["stem_splits"]
    x0 = stem[..., :c0]
    x1 = sep_forward(p["b1_1"], stem[..., c0:c0 + c1], stride=1, padding=1)
    x2 = sep_forward(p["b2_1"], stem[..., c0 + c1:c0 + c1 + c2], stride=1, padding=1)
    x3 = maxpool3d(x, kernel=(3, 3, 3), stride=(1, 1, 1), padding=(1, 1, 1))
    x3 = basic_forward(p["b3"], x3)
    # torch.cat((x0,x1,x2,x3), dim=1) == channels-last concat here
    return jnp.concatenate([x0, x1, x2, x3], axis=-1)


def s3d_forward(params, x_btchw):
    # PyTorch forward: x.transpose(2,1) -> (B,C,T,H,W); here straight to NDHWC.
    x = jnp.transpose(x_btchw, (0, 1, 3, 4, 2)).astype(jnp.bfloat16)

    x = sep_forward(params["base_sep1"], x, stride=2, padding=3)
    x = maxpool3d(x, kernel=(1, 3, 3), stride=(1, 2, 2), padding=(0, 1, 1))
    x = basic_forward(params["base_basic"], x)
    x = sep_forward(params["base_sep2"], x, stride=1, padding=1)
    x = maxpool3d(x, kernel=(1, 3, 3), stride=(1, 2, 2), padding=(0, 1, 1))
    x = mixed_forward(params["m3b"], x)
    x = mixed_forward(params["m3c"], x)
    x = maxpool3d(x, kernel=(3, 3, 3), stride=(2, 2, 2), padding=(1, 1, 1))
    for name in ("m4b", "m4c", "m4d", "m4e", "m4f"):
        x = mixed_forward(params[name], x)
    x = maxpool3d(x, kernel=(2, 2, 2), stride=(2, 2, 2), padding=(0, 0, 0))
    x = mixed_forward(params["m5b"], x)
    x = mixed_forward(params["m5c"], x)          # (B, T', H', W', 1024)

    # F.avg_pool3d(y, (1,H,W)) + squeeze + permute(0,2,1) -> (B, T', 1024)
    clipwise_output = jnp.mean(x.astype(jnp.float32), axis=(2, 3))
    # TODO(synk): video_logits / fc / logits in the PyTorch forward do not
    # affect the returned value (clipwise_output) and are skipped.
    return clipwise_output


# ----------------------------------------------------------------------------

if __name__ == "__main__":
    key = jax.random.PRNGKey(0)
    pkey, xkey = jax.random.split(key)
    params = init_params(pkey)

    B, T, C, H, W = 2, 8, 3, 32, 32        # module expects (B, T, 3, H, W)
    x = jax.random.normal(xkey, (B, T, C, H, W), jnp.float32)

    out = s3d_forward(params, x)
    out = jax.block_until_ready(out)
    assert out.shape == (2, 1, 1024), out.shape
    assert bool(jnp.all(jnp.isfinite(out)))
    print("KERNEL_OK")
</pallas_src>

<mosaic_0001>
module attributes {stable_mosaic.version = 11 : i64} {
  func.func @_matmul_bn_relu_kernel(%arg0: i32, %arg1: i32, %arg2: i32, %arg3: memref<512x256xbf16, #tpu.memory_space<vmem>>, %arg4: memref<256x128xbf16, #tpu.memory_space<vmem>>, %arg5: memref<1x128xf32, #tpu.memory_space<vmem>>, %arg6: memref<1x128xf32, #tpu.memory_space<vmem>>, %arg7: memref<512x128xbf16, #tpu.memory_space<vmem>>, %arg8: memref<512x128xf32, #tpu.memory_space<vmem>>) attributes {dimension_semantics = [#tpu.dimension_semantics<parallel>, #tpu.dimension_semantics<parallel>, #tpu.dimension_semantics<arbitrary>], iteration_bounds = array<i64: 8, 1, 1>, scalar_prefetch = 0 : i64, scratch_operands = 1 : i64, tpu.core_type = #tpu.core_type<tc>, window_params = [{transform_indices = @transform_0, window_bounds = array<i64: 512, 256>}, {transform_indices = @transform_1, window_bounds = array<i64: 256, 128>}, {transform_indices = @transform_2, window_bounds = array<i64: 1, 128>}, {transform_indices = @transform_3, window_bounds = array<i64: 1, 128>}, {transform_indices = @transform_4, window_bounds = array<i64: 512, 128>}]} {
    %c0_i32 = arith.constant 0 : i32
    %0 = arith.cmpi eq, %arg2, %c0_i32 : i32
    %1 = arith.extui %0 : i1 to i32
    %c0_i32_0 = arith.constant 0 : i32
    %2 = arith.cmpi ne, %1, %c0_i32_0 : i32
    scf.if %2 {
      %cst_10 = arith.constant 0.000000e+00 : f32
      %12 = vector.broadcast %cst_10 : f32 to vector<512x128xf32>
      %c0_11 = arith.constant 0 : index
      %c0_12 = arith.constant 0 : index
      %13 = vector.load %arg8[%c0_11, %c0_12] : memref<512x128xf32, #tpu.memory_space<vmem>>, vector<512x128xf32>
      tpu.vector_store %arg8[%c0_11, %c0_12], %12 {strides = array<i32>} : memref<512x128xf32, #tpu.memory_space<vmem>>, vector<512x128xf32>,
    } else {
    }
    %c0 = arith.constant 0 : index
    %c0_1 = arith.constant 0 : index
    %3 = vector.load %arg8[%c0, %c0_1] : memref<512x128xf32, #tpu.memory_space<vmem>>, vector<512x128xf32>
    %c0_2 = arith.constant 0 : index
    %c0_3 = arith.constant 0 : index
    %4 = vector.load %arg3[%c0_2, %c0_3] : memref<512x256xbf16, #tpu.memory_space<vmem>>, vector<512x256xbf16>
    %c0_4 = arith.constant 0 : index
    %c0_5 = arith.constant 0 : index
    %5 = vector.load %arg4[%c0_4, %c0_5] : memref<256x128xbf16, #tpu.memory_space<vmem>>, vector<256x128xbf16>
    %cst = arith.constant dense<0.000000e+00> : vector<512x128xf32>
    %6 = tpu.matmul %4, %5, %cst {dimension_numbers = #tpu.dot_dimension_numbers<[1], [0], [0], [1], [0, 0, 1, 1], [], []>} : vector<512x256xbf16>, vector<256x128xbf16>, vector<512x128xf32> -> vector<512x128xf32>
    %7 = arith.addf %3, %6 : vector<512x128xf32>
    %c0_6 = arith.constant 0 : index
    %c0_7 = arith.constant 0 : index
    %8 = vector.load %arg8[%c0_6, %c0_7] : memref<512x128xf32, #tpu.memory_space<vmem>>, vector<512x128xf32>
    tpu.vector_store %arg8[%c0_6, %c0_7], %7 {strides = array<i32>} : memref<512x128xf32, #tpu.memory_space<vmem>>, vector<512x128xf32>,
    %c0_i32_8 = arith.constant 0 : i32
    %9 = arith.cmpi eq, %arg2, %c0_i32_8 : i32
    %10 = arith.extui %9 : i1 to i32
    %c0_i32_9 = arith.constant 0 : i32
    %11 = arith.cmpi ne, %10, %c0_i32_9 : i32
    scf.if %11 {
      %c0_10 = arith.constant 0 : index
      %c0_11 = arith.constant 0 : index
      %12 = vector.load %arg8[%c0_10, %c0_11] : memref<512x128xf32, #tpu.memory_space<vmem>>, vector<512x128xf32>
      %c0_12 = arith.constant 0 : index
      %c0_13 = arith.constant 0 : index
      %13 = vector.load %arg5[%c0_12, %c0_13] : memref<1x128xf32, #tpu.memory_space<vmem>>, vector<1x128xf32>
      %14 = vector.broadcast %13 : vector<1x128xf32> to vector<512x128xf32>
      %15 = arith.mulf %12, %14 : vector<512x128xf32>
      %c0_14 = arith.constant 0 : index
      %c0_15 = arith.constant 0 : index
      %16 = vector.load %arg6[%c0_14, %c0_15] : memref<1x128xf32, #tpu.memory_space<vmem>>, vector<1x128xf32>
      %17 = vector.broadcast %16 : vector<1x128xf32> to vector<512x128xf32>
      %18 = arith.addf %15, %17 : vector<512x128xf32>
      %cst_16 = arith.constant 0.000000e+00 : f32
      %19 = vector.broadcast %cst_16 : f32 to vector<512x128xf32>
      %20 = arith.maximumf %18, %19 : vector<512x128xf32>
      %21 = arith.truncf %20 : vector<512x128xf32> to vector<512x128xbf16>
      %c0_17 = arith.constant 0 : index
      %c0_18 = arith.constant 0 : index
      %22 = vector.load %arg7[%c0_17, %c0_18] : memref<512x128xbf16, #tpu.memory_space<vmem>>, vector<512x128xbf16>
      tpu.vector_store %arg7[%c0_17, %c0_18], %21 {strides = array<i32>} : memref<512x128xbf16, #tpu.memory_space<vmem>>, vector<512x128xbf16>,
    } else {
    }
    return
  }
  func.func @transform_0(%arg0: i32, %arg1: i32, %arg2: i32) -> (i32, i32) {
    %c0_i32 = arith.constant 0 : i32
    return %arg0, %arg2 : i32, i32
  }
  func.func @transform_1(%arg0: i32, %arg1: i32, %arg2: i32) -> (i32, i32) {
    %c0_i32 = arith.constant 0 : i32
    return %arg2, %arg1 : i32, i32
  }
  func.func @transform_2(%arg0: i32, %arg1: i32, %arg2: i32) -> (i32, i32) {
    %c0_i32 = arith.constant 0 : i32
    %c0_i32_0 = arith.constant 0 : i32
    return %c0_i32, %arg1 : i32, i32
  }
  func.func @transform_3(%arg0: i32, %arg1: i32, %arg2: i32) -> (i32, i32) {
    %c0_i32 = arith.constant 0 : i32
    %c0_i32_0 = arith.constant 0 : i32
    return %c0_i32, %arg1 : i32, i32
  }
  func.func @transform_4(%arg0: i32, %arg1: i32, %arg2: i32) -> (i32, i32) {
    %c0_i32 = arith.constant 0 : i32
    return %arg0, %arg1 : i32, i32
  }
}

</mosaic_0001>

<bundles_post_ra>
// kernel: _fused_matmul_bn_relu.1
= control target key start
LH: loop header
LB: loop body
LE: loop exit
PB: predicated region body
PF: predicated region fallthrough
CT: control target
= control target key end

     0   :  { %s2725_s15 = smov 0   ;;  %s2727_s16 = smov 0   ;;  %s3080_s0 = inlined_call_operand.vmem [shape: bf16[4096,256], index: 0, kind: input, shape index: {}]   ;;  %s3081_s1 = inlined_call_operand.vmem [shape: bf16[256,128], index: 1, kind: input, shape index: {}]   ;;  %s3082_s2 = inlined_call_operand.vmem [shape: f32[1,128], index: 2, kind: input, shape index: {}]   ;;  %s3083_s3 = inlined_call_operand.vmem [shape: f32[1,128], index: 3, kind: input, shape index: {}]   ;;  %s3084_s4 = inlined_call_operand.vmem [shape: bf16[4096,128], index: 4, kind: output, shape index: {}]  }
   0x1   :  { %s2729_s17 = smov 0  }
   0x2 LB: > { %s33_s18 = sadd.s32 1, %s2693_s16  ;;  %p2096_p0 = scmp.ge.s32.totalorder %s2697_s17, 1  ;;  %s2697_s17 = sphi %s2729_s17, %s14_s17   ;;  %s2693_s16 = sphi %s2727_s16, %s3086_s16   ;;  %s2689_s15 = sphi %s2725_s15, %s3085_s15  }
   0x3   : > { %p35_p1 = scmp.ge.s32.totalorder %s33_s18, 8  ;;  %p224_p2 = scmp.lt.s32.totalorder %s2697_s17, 9 }
   0x5   : > { %s3088_s18 = smov (%p35_p1, %s33_s18), 0  ;;  %p225_p3 = pnand %p2096_p0, %p224_p2 }
   0x6   : > { %s2097_s21 = sshll.u32 (!%p225_p3), %s2689_s15, 6 }
   0x7   : > { %228 = sbr.rel (%p225_p3) target bundleno = 403 (0x193), region = 36  ;;  %p274_p4 = scmp.lt.s32.totalorder (!%p225_p3), %s2097_s21, 511 }
   0xc   : > { %v2563_v0 = vld [vmem:[%s3081_s1 + $0x38] sm:$0xff]   ;;  %v2699_v1 = vmov 0   ;;  %v2564_v2 = vld [vmem:[%s3081_s1 + $0x30] sm:$0xff]   ;;  %v2565_v3 = vld [vmem:[%s3081_s1 + $0x28] sm:$0xff]   ;;  %s3090_s21 = smov (!%p274_p4, %s2097_s21), 511 }
   0xd   : > { %953 = vmatprep.subr.bf16.mxu0 %v2699_v1  ;;  %2506 = vmatprep.subr.bf16.mxu1 %v2699_v1  ;;  %v2566_v4 = vld [vmem:[%s3081_s1 + $0x20] sm:$0xff]   ;;  %s2250_s28 = sshll.u32 %s3090_s21, 3  ;;  %v2567_v5 = vld [vmem:[%s3081_s1 + $0x18] sm:$0xff]   ;;  %v2568_v7 = vld [vmem:[%s3081_s1 + $0x10] sm:$0xff]  }
   0xe   : > { %954 = vmatpush1.bf16.msra.mxu0 %v2563_v0  ;;  %2522 = vmatpush1.bf16.msra.mxu1 %v2563_v0  ;;  %s2772_s7 = scalar_lea.vmem %s3080_s0, %s2250_s28  ;;  %v2569_v9 = vld [vmem:[%s3081_s1 + $0x8] sm:$0xff]   ;;  %v2570_v10 = vld [vmem:[%s3081_s1] sm:$0xff]   ;;  %v2571_v11 = vld [vmem:[%s3081_s1 + $0x78] sm:$0xff]  }
   0xf   : > { %955 = vmatprep.subr.bf16.mxu0 %v2699_v1  ;;  %2507 = vmatprep.subr.bf16.mxu1 %v2699_v1  ;;  %v2581_v6 = vld [vmem:[%s2772_s7 + $0x4] ss:$8 sps:$4 sm:$0xff]   ;;  %v2572_v12 = vld [vmem:[%s3081_s1 + $0x70] sm:$0xff]   ;;  %v2575_v15 = vld [vmem:[%s3081_s1 + $0x58] sm:$0xff]  }
  0x10   : > { %v2584_v8 = vld [vmem:[%s2772_s7 + $0x104] ss:$8 sps:$4 sm:$0xff]   ;;  %985 = vmatprep.mubr.bf16.mxu0 %v2581_v6  ;;  %v2576_v16 = vld [vmem:[%s3081_s1 + $0x50] sm:$0xff]   ;;  %v2579_v19 = vld [vmem:[%s2772_s7] ss:$8 sps:$4 sm:$0xff]  }
  0x11   : > { %1113 = vmatprep.mubr.bf16.mxu1 %v2584_v8  ;;  %v2573_v13 = vld [vmem:[%s3081_s1 + $0x68] sm:$0xff]   ;;  %v2574_v14 = vld [vmem:[%s3081_s1 + $0x60] sm:$0xff]   ;;  %v2585_v21 = vld [vmem:[%s2772_s7 + $0x14] ss:$8 sps:$4 sm:$0xff]  }
  0x12   : > { %956 = vmatpush1.bf16.msra.mxu0 %v2564_v2  ;;  %2523 = vmatpush1.bf16.msra.mxu1 %v2564_v2  ;;  %v2577_v17 = vld [vmem:[%s3081_s1 + $0x48] sm:$0xff]   ;;  %v2578_v18 = vld [vmem:[%s3081_s1 + $0x40] sm:$0xff]   ;;  %v2587_v22 = vld [vmem:[%s2772_s7 + $0x114] ss:$8 sps:$4 sm:$0xff]  }
  0x13   : > { %957 = vmatprep.subr.bf16.mxu0 %v2699_v1  ;;  %2508 = vmatprep.subr.bf16.mxu1 %v2699_v1  ;;  %v2582_v20 = vld [vmem:[%s2772_s7 + $0x100] ss:$8 sps:$4 sm:$0xff]   ;;  %v2589_v23 = vld [vmem:[%s2772_s7 + $0x10] ss:$8 sps:$4 sm:$0xff]   ;;  %v2591_v25 = vld [vmem:[%s2772_s7 + $0x24] ss:$8 sps:$4 sm:$0xff]  }
  0x14   : > { %v2590_v24 = vld [vmem:[%s2772_s7 + $0x110] ss:$8 sps:$4 sm:$0xff]   ;;  %v2593_v26 = vld [vmem:[%s2772_s7 + $0x124] ss:$8 sps:$4 sm:$0xff]   ;;  %v2595_v27 = vld [vmem:[%s2772_s7 + $0x20] ss:$8 sps:$4 sm:$0xff]  }
  0x15   : > { %v2596_v28 = vld [vmem:[%s2772_s7 + $0x120] ss:$8 sps:$4 sm:$0xff]   ;;  %v2597_v29 = vld [vmem:[%s2772_s7 + $0x34] ss:$8 sps:$4 sm:$0xff]   ;;  %v2601_v31 = vld [vmem:[%s2772_s7 + $0x30] ss:$8 sps:$4 sm:$0xff]  }
  0x16   : > { %958 = vmatpush1.bf16.msra.mxu0 %v2565_v3  ;;  %2524 = vmatpush1.bf16.msra.mxu1 %v2565_v3  ;;  %v2599_v30 = vld [vmem:[%s2772_s7 + $0x134] ss:$8 sps:$4 sm:$0xff]   ;;  %v2602_v32 = vld [vmem:[%s2772_s7 + $0x130] ss:$8 sps:$4 sm:$0xff]   ;;  %v2603_v33 = vld [vmem:[%s2772_s7 + $0x44] ss:$8 sps:$4 sm:$0xff]  }
  0x17   : > { %959 = vmatprep.subr.bf16.mxu0 %v2699_v1  ;;  %2509 = vmatprep.subr.bf16.mxu1 %v2699_v1  ;;  %v2605_v34 = vld [vmem:[%s2772_s7 + $0x144] ss:$8 sps:$4 sm:$0xff]   ;;  %v2607_v35 = vld [vmem:[%s2772_s7 + $0x40] ss:$8 sps:$4 sm:$0xff]   ;;  %v2609_v37 = vld [vmem:[%s2772_s7 + $0x54] ss:$8 sps:$4 sm:$0xff]  }
  0x18   : > { %v2608_v36 = vld [vmem:[%s2772_s7 + $0x140] ss:$8 sps:$4 sm:$0xff]   ;;  %v2611_v38 = vld [vmem:[%s2772_s7 + $0x154] ss:$8 sps:$4 sm:$0xff]   ;;  %v2613_v39 = vld [vmem:[%s2772_s7 + $0x50] ss:$8 sps:$4 sm:$0xff]  }
  0x19   : > { %v2614_v40 = vld [vmem:[%s2772_s7 + $0x150] ss:$8 sps:$4 sm:$0xff]   ;;  %v2615_v41 = vld [vmem:[%s2772_s7 + $0x64] ss:$8 sps:$4 sm:$0xff]   ;;  %v2619_v43 = vld [vmem:[%s2772_s7 + $0x60] ss:$8 sps:$4 sm:$0xff]  }
  0x1a   : > { %960 = vmatpush1.bf16.msra.mxu0 %v2566_v4  ;;  %2525 = vmatpush1.bf16.msra.mxu1 %v2566_v4  ;;  %v2617_v42 = vld [vmem:[%s2772_s7 + $0x164] ss:$8 sps:$4 sm:$0xff]   ;;  %v2620_v44 = vld [vmem:[%s2772_s7 + $0x160] ss:$8 sps:$4 sm:$0xff]   ;;  %v2621_v45 = vld [vmem:[%s2772_s7 + $0x74] ss:$8 sps:$4 sm:$0xff]  }
  0x1b   : > { %961 = vmatprep.subr.bf16.mxu0 %v2699_v1  ;;  %2510 = vmatprep.subr.bf16.mxu1 %v2699_v1  ;;  %v2623_v46 = vld [vmem:[%s2772_s7 + $0x174] ss:$8 sps:$4 sm:$0xff]   ;;  %v2625_v47 = vld [vmem:[%s2772_s7 + $0x70] ss:$8 sps:$4 sm:$0xff]   ;;  %v2627_v49 = vld [vmem:[%s2772_s7 + $0x84] ss:$8 sps:$4 sm:$0xff]  }
  0x1c   : > { %v2626_v48 = vld [vmem:[%s2772_s7 + $0x170] ss:$8 sps:$4 sm:$0xff]   ;;  %v2629_v50 = vld [vmem:[%s2772_s7 + $0x184] ss:$8 sps:$4 sm:$0xff]   ;;  %v2631_v51 = vld [vmem:[%s2772_s7 + $0x80] ss:$8 sps:$4 sm:$0xff]  }
  0x1d   : > { %v2632_v52 = vld [vmem:[%s2772_s7 + $0x180] ss:$8 sps:$4 sm:$0xff]   ;;  %v2633_v53 = vld [vmem:[%s2772_s7 + $0x94] ss:$8 sps:$4 sm:$0xff]   ;;  %v2637_v55 = vld [vmem:[%s2772_s7 + $0x90] ss:$8 sps:$4 sm:$0xff]  }
  0x1e   : > { %962 = vmatpush1.bf16.msra.mxu0 %v2567_v5  ;;  %2526 = vmatpush1.bf16.msra.mxu1 %v2567_v5  ;;  %v2635_v54 = vld [vmem:[%s2772_s7 + $0x194] ss:$8 sps:$4 sm:$0xff]   ;;  %v2638_v56 = vld [vmem:[%s2772_s7 + $0x190] ss:$8 sps:$4 sm:$0xff]   ;;  %v2639_v57 = vld [vmem:[%s2772_s7 + $0xa4] ss:$8 sps:$4 sm:$0xff]  }
  0x1f   : > { %963 = vmatprep.subr.bf16.mxu0 %v2699_v1  ;;  %2511 = vmatprep.subr.bf16.mxu1 %v2699_v1  ;;  %v2641_v58 = vld [vmem:[%s2772_s7 + $0x1a4] ss:$8 sps:$4 sm:$0xff]   ;;  %v2643_v59 = vld [vmem:[%s2772_s7 + $0xa0] ss:$8 sps:$4 sm:$0xff]   ;;  %v2645_v61 = vld [vmem:[%s2772_s7 + $0xb4] ss:$8 sps:$4 sm:$0xff]  }
  0x20   : > { %v2644_v60 = vld [vmem:[%s2772_s7 + $0x1a0] ss:$8 sps:$4 sm:$0xff]   ;;  %v2647_v62 = vld [vmem:[%s2772_s7 + $0x1b4] ss:$8 sps:$4 sm:$0xff]   ;;  %v2649_v63 = vld [vmem:[%s2772_s7 + $0xb0] ss:$8 sps:$4 sm:$0xff]  }
  0x21   : > { %v2650_v0 = vld [vmem:[%s2772_s7 + $0x1b0] ss:$8 sps:$4 sm:$0xff]   ;;  %v2653_v2 = vld [vmem:[%s2772_s7 + $0x1c4] ss:$8 sps:$4 sm:$0xff]   ;;  %v2655_v3 = vld [vmem:[%s2772_s7 + $0xc0] ss:$8 sps:$4 sm:$0xff]  }
  0x22   : > { %964 = vmatpush1.bf16.msra.mxu0 %v2568_v7  ;;  %2527 = vmatpush1.bf16.msra.mxu1 %v2568_v7  ;;  %v2656_v4 = vld [vmem:[%s2772_s7 + $0x1c0] ss:$8 sps:$4 sm:$0xff]   ;;  %v2657_v5 = vld [vmem:[%s2772_s7 + $0xd4] ss:$8 sps:$4 sm:$0xff]   ;;  %v2661_v7 = vld [vmem:[%s2772_s7 + $0xd0] ss:$8 sps:$4 sm:$0xff]  }
  0x23   : > { %965 = vmatprep.subr.bf16.mxu0 %v2699_v1  ;;  %2512 = vmatprep.subr.bf16.mxu1 %v2699_v1  ;;  %v2659_v6 = vld [vmem:[%s2772_s7 + $0x1d4] ss:$8 sps:$4 sm:$0xff]   ;;  %v2662_v8 = vld [vmem:[%s2772_s7 + $0x1d0] ss:$8 sps:$4 sm:$0xff]  }
  0x26   : > { %966 = vmatpush1.bf16.msra.mxu0 %v2569_v9  ;;  %2528 = vmatpush1.bf16.msra.mxu1 %v2569_v9  ;;  %v2663_v9 = vld [vmem:[%s2772_s7 + $0xe4] ss:$8 sps:$4 sm:$0xff]  }
  0x27   : > { %967 = vmatprep.subr.bf16.mxu0 %v2699_v1  ;;  %2513 = vmatprep.subr.bf16.mxu1 %v2699_v1 }
  0x2a   : > { %968 = vmatpush1.bf16.msra.mxu0 %v2570_v10  ;;  %2529 = vmatpush1.bf16.msra.mxu1 %v2570_v10  ;;  %v2665_v10 = vld [vmem:[%s2772_s7 + $0x1e4] ss:$8 sps:$4 sm:$0xff]  }
  0x2b   : > { %969 = vmatprep.subr.bf16.mxu0 %v2699_v1  ;;  %2514 = vmatprep.subr.bf16.mxu1 %v2699_v1 }
  0x2e   : > { %970 = vmatpush2.bf16.msra.mxu0 %v2571_v11  ;;  %2530 = vmatpush2.bf16.msra.mxu1 %v2571_v11  ;;  %v2667_v11 = vld [vmem:[%s2772_s7 + $0xe0] ss:$8 sps:$4 sm:$0xff]  }
  0x2f   : > { %971 = vmatprep.subr.bf16.mxu0 %v2699_v1  ;;  %2515 = vmatprep.subr.bf16.mxu1 %v2699_v1 }
  0x32   : > { %972 = vmatpush2.bf16.msra.mxu0 %v2572_v12  ;;  %2531 = vmatpush2.bf16.msra.mxu1 %v2572_v12  ;;  %v2668_v12 = vld [vmem:[%s2772_s7 + $0x1e0] ss:$8 sps:$4 sm:$0xff]  }
  0x33   : > { %973 = vmatprep.subr.bf16.mxu0 %v2699_v1  ;;  %2516 = vmatprep.subr.bf16.mxu1 %v2699_v1 }
  0x36   : > { %974 = vmatpush2.bf16.msra.mxu0 %v2573_v13  ;;  %2532 = vmatpush2.bf16.msra.mxu1 %v2573_v13  ;;  %v2669_v13 = vld [vmem:[%s2772_s7 + $0xf4] ss:$8 sps:$4 sm:$0xff]  }
  0x37   : > { %975 = vmatprep.subr.bf16.mxu0 %v2699_v1  ;;  %2517 = vmatprep.subr.bf16.mxu1 %v2699_v1 }
  0x3a   : > { %976 = vmatpush2.bf16.msra.mxu0 %v2574_v14  ;;  %2533 = vmatpush2.bf16.msra.mxu1 %v2574_v14  ;;  %v2671_v14 = vld [vmem:[%s2772_s7 + $0x1f4] ss:$8 sps:$4 sm:$0xff]  }
  0x3b   : > { %977 = vmatprep.subr.bf16.mxu0 %v2699_v1  ;;  %2518 = vmatprep.subr.bf16.mxu1 %v2699_v1 }
  0x3e   : > { %978 = vmatpush2.bf16.msra.mxu0 %v2575_v15  ;;  %2534 = vmatpush2.bf16.msra.mxu1 %v2575_v15  ;;  %v2673_v15 = vld [vmem:[%s2772_s7 + $0xf0] ss:$8 sps:$4 sm:$0xff]  }
  0x3f   : > { %979 = vmatprep.subr.bf16.mxu0 %v2699_v1  ;;  %2519 = vmatprep.subr.bf16.mxu1 %v2699_v1 }
  0x42   : > { %980 = vmatpush2.bf16.msra.mxu0 %v2576_v16  ;;  %2535 = vmatpush2.bf16.msra.mxu1 %v2576_v16  ;;  %v2674_v16 = vld [vmem:[%s2772_s7 + $0x1f0] ss:$8 sps:$4 sm:$0xff]  }
  0x43   : > { %981 = vmatprep.subr.bf16.mxu0 %v2699_v1  ;;  %2520 = vmatprep.subr.bf16.mxu1 %v2699_v1 }
  0x46   : > { %982 = vmatpush2.bf16.msra.mxu0 %v2577_v17  ;;  %2536 = vmatpush2.bf16.msra.mxu1 %v2577_v17  ;;  %v2898_v17 = vld [vmem:[%s3082_s2] ss:$0 sm:$0xff] }
  0x47   : > { %983 = vmatprep.subr.bf16.mxu0 %v2699_v1  ;;  %2521 = vmatprep.subr.bf16.mxu1 %v2699_v1  ;;  %v2651_v1 = vld [vmem:[%s2772_s7 + $0xc4] ss:$8 sps:$4 sm:$0xff]   ;;  %s2101_s7 = sshll.u32 %s3090_s21, 2 }
  0x48   : > { %s2919_s15 = scalar_lea.vmem %s3084_s4, %s2101_s7 }
  0x4a   : > { %984 = vmatpush2.bf16.msra.mxu0 %v2578_v18  ;;  %2537 = vmatpush2.bf16.msra.mxu1 %v2578_v18 }
  0x4d   : > { %986 = vmatmul.mubr.bf16.vlgmr.msra.gmra.mxu0 %v2579_v19  ;;  %1114 = vmatmul.mubr.bf16.vlgmr.msra.gmra.mxu1 %v2582_v20 }
  0x4e   : > { %993 = vmatprep.mubr.bf16.mxu0 %v2585_v21  ;;  %1121 = vmatprep.mubr.bf16.mxu1 %v2587_v22  ;;  %v2904_v21 = vld [vmem:[%s3083_s3] ss:$0 sm:$0xff] }
  0x55   : > { %994 = vmatmul.mubr.bf16.gmra.mxu0 %v2589_v23  ;;  %1122 = vmatmul.mubr.bf16.gmra.mxu1 %v2590_v24 }
  0x56   : > { %1001 = vmatprep.mubr.bf16.mxu0 %v2591_v25  ;;  %1129 = vmatprep.mubr.bf16.mxu1 %v2593_v26 }
  0x5d   : > { %1002 = vmatmul.mubr.bf16.gmra.mxu0 %v2595_v27  ;;  %1130 = vmatmul.mubr.bf16.gmra.mxu1 %v2596_v28 }
  0x5e   : > { %1009 = vmatprep.mubr.bf16.mxu0 %v2597_v29  ;;  %1137 = vmatprep.mubr.bf16.mxu1 %v2599_v30 }
  0x65   : > { %1010 = vmatmul.mubr.bf16.gmra.mxu0 %v2601_v31  ;;  %1138 = vmatmul.mubr.bf16.gmra.mxu1 %v2602_v32 }
  0x66   : > { %1017 = vmatprep.mubr.bf16.mxu0 %v2603_v33  ;;  %1145 = vmatprep.mubr.bf16.mxu1 %v2605_v34 }
  0x6d   : > { %1018 = vmatmul.mubr.bf16.gmra.mxu0 %v2607_v35  ;;  %1146 = vmatmul.mubr.bf16.gmra.mxu1 %v2608_v36 }
  0x6e   : > { %1025 = vmatprep.mubr.bf16.mxu0 %v2609_v37  ;;  %1153 = vmatprep.mubr.bf16.mxu1 %v2611_v38 }
  0x75   : > { %1026 = vmatmul.mubr.bf16.gmra.mxu0 %v2613_v39  ;;  %1154 = vmatmul.mubr.bf16.gmra.mxu1 %v2614_v40 }
  0x76   : > { %1033 = vmatprep.mubr.bf16.mxu0 %v2615_v41  ;;  %1161 = vmatprep.mubr.bf16.mxu1 %v2617_v42 }
  0x7d   : > { %1034 = vmatmul.mubr.bf16.gmra.mxu0 %v2619_v43  ;;  %1162 = vmatmul.mubr.bf16.gmra.mxu1 %v2620_v44 }
  0x7e   : > { %1041 = vmatprep.mubr.bf16.mxu0 %v2621_v45  ;;  %1169 = vmatprep.mubr.bf16.mxu1 %v2623_v46 }
  0x85   : > { %1042 = vmatmul.mubr.bf16.gmra.mxu0 %v2625_v47  ;;  %1170 = vmatmul.mubr.bf16.gmra.mxu1 %v2626_v48 }
  0x86   : > { %1049 = vmatprep.mubr.bf16.mxu0 %v2627_v49  ;;  %1177 = vmatprep.mubr.bf16.mxu1 %v2629_v50 }
  0x8d   : > { %1050 = vmatmul.mubr.bf16.gmra.mxu0 %v2631_v51  ;;  %1178 = vmatmul.mubr.bf16.gmra.mxu1 %v2632_v52 }
  0x8e   : > { %1057 = vmatprep.mubr.bf16.mxu0 %v2633_v53  ;;  %1185 = vmatprep.mubr.bf16.mxu1 %v2635_v54 }
  0x95   : > { %1058 = vmatmul.mubr.bf16.gmra.mxu0 %v2637_v55  ;;  %1186 = vmatmul.mubr.bf16.gmra.mxu1 %v2638_v56 }
  0x96   : > { %1065 = vmatprep.mubr.bf16.mxu0 %v2639_v57  ;;  %1193 = vmatprep.mubr.bf16.mxu1 %v2641_v58 }
  0x9d   : > { %1066 = vmatmul.mubr.bf16.gmra.mxu0 %v2643_v59  ;;  %1194 = vmatmul.mubr.bf16.gmra.mxu1 %v2644_v60 }
  0x9e   : > { %1073 = vmatprep.mubr.bf16.mxu0 %v2645_v61  ;;  %1201 = vmatprep.mubr.bf16.mxu1 %v2647_v62 }
  0xa5   : > { %1074 = vmatmul.mubr.bf16.gmra.mxu0 %v2649_v63  ;;  %1202 = vmatmul.mubr.bf16.gmra.mxu1 %v2650_v0 }
  0xa6   : > { %1081 = vmatprep.mubr.bf16.mxu0 %v2651_v1  ;;  %1209 = vmatprep.mubr.bf16.mxu1 %v2653_v2 }
  0xad   : > { %1082 = vmatmul.mubr.bf16.gmra.mxu0 %v2655_v3  ;;  %1210 = vmatmul.mubr.bf16.gmra.mxu1 %v2656_v4 }
  0xae   : > { %1089 = vmatprep.mubr.bf16.mxu0 %v2657_v5  ;;  %1217 = vmatprep.mubr.bf16.mxu1 %v2659_v6 }
  0xb5   : > { %1090 = vmatmul.mubr.bf16.gmra.mxu0 %v2661_v7  ;;  %1218 = vmatmul.mubr.bf16.gmra.mxu1 %v2662_v8 }
  0xb6   : > { %1097 = vmatprep.mubr.bf16.mxu0 %v2663_v9  ;;  %1225 = vmatprep.mubr.bf16.mxu1 %v2665_v10 }
  0xbd   : > { %1098 = vmatmul.mubr.bf16.gmra.mxu0 %v2667_v11  ;;  %1226 = vmatmul.mubr.bf16.gmra.mxu1 %v2668_v12 }
  0xbe   : > { %1105 = vmatprep.mubr.bf16.mxu0 %v2669_v13  ;;  %1233 = vmatprep.mubr.bf16.mxu1 %v2671_v14 }
  0xc5   : > { %1106 = vmatmul.mubr.bf16.gmra.mxu0 %v2673_v15  ;;  %1234 = vmatmul.mubr.bf16.gmra.mxu1 %v2674_v16 }
 0x10d   : > { %v987_v18 = vpop.f32.mrf.mxu0  ;;  %v1115_v19 = vpop.f32.mrf.mxu1 }
 0x10e   : > { %v1444_v20 = vmul.f32 %v2898_v17, %v987_v18  ;;  %v1476_v22 = vmul.f32 %v2898_v17, %v1115_v19 }
 0x10f   : > { %v989_v23 = vpop.f32.mrf.mxu0  ;;  %v1117_v24 = vpop.f32.mrf.mxu1 }
 0x110   : > { %v1515_v25 = vadd.f32 %v2904_v21, %v1444_v20  ;;  %v1547_v26 = vadd.f32 %v2904_v21, %v1476_v22 }
 0x111   : > { %v990_v27 = vpop.f32.mrf.mxu0  ;;  %v1118_v28 = vpop.f32.mrf.mxu1 }
 0x112   : > { %v1445_v29 = vmul.f32 %v2898_v17, %v990_v27  ;;  %v1477_v30 = vmul.f32 %v2898_v17, %v1118_v28  ;;  %v1579_v35 = vmax.f32 %v1515_v25, 0.0  ;;  %v1611_v36 = vmax.f32 %v1547_v26, 0.0 }
 0x113   : > { %v992_v31 = vpop.f32.mrf.mxu0  ;;  %v1120_v32 = vpop.f32.mrf.mxu1 }
 0x114   : > { %v1516_v33 = vadd.f32 %v2904_v21, %v1445_v29  ;;  %v1548_v34 = vadd.f32 %v2904_v21, %v1477_v30 }
 0x115   : > { %v995_v37 = vpop.f32.mrf.mxu0  ;;  %v1123_v38 = vpop.f32.mrf.mxu1 }
 0x116   : > { %v1580_v39 = vmax.f32 %v1516_v33, 0.0  ;;  %v1612_v40 = vmax.f32 %v1548_v34, 0.0  ;;  %v1446_v41 = vmul.f32 %v2898_v17, %v995_v37  ;;  %v1478_v42 = vmul.f32 %v2898_v17, %v1123_v38 }
 0x117   : > { %v997_v43 = vpop.f32.mrf.mxu0  ;;  %v1125_v44 = vpop.f32.mrf.mxu1 }
 0x118   : > { %v2318_v45 = vpack.c.bf16 %v1580_v39, %v1579_v35  ;;  %v2398_v46 = vpack.c.bf16 %v1612_v40, %v1611_v36  ;;  %v1517_v47 = vadd.f32 %v2904_v21, %v1446_v41  ;;  %v1549_v48 = vadd.f32 %v2904_v21, %v1478_v42 }
 0x119   : > { %v998_v49 = vpop.f32.mrf.mxu0  ;;  %v1126_v50 = vpop.f32.mrf.mxu1 }
 0x11a   : > { %2319 = vst [vmem:[%s2919_s15] sm:$0xff] %v2318_v45   ;;  %2490 = vst [vmem:[%s2919_s15 + $0x80] sm:$0xff] %v2398_v46   ;;  %v1447_v51 = vmul.f32 %v2898_v17, %v998_v49  ;;  %v1479_v52 = vmul.f32 %v2898_v17, %v1126_v50  ;;  %v1581_v57 = vmax.f32 %v1517_v47, 0.0  ;;  %v1613_v58 = vmax.f32 %v1549_v48, 0.0 }
 0x11b   : > { %v1000_v53 = vpop.f32.mrf.mxu0  ;;  %v1128_v54 = vpop.f32.mrf.mxu1 }
 0x11c   : > { %v1518_v55 = vadd.f32 %v2904_v21, %v1447_v51  ;;  %v1550_v56 = vadd.f32 %v2904_v21, %v1479_v52 }
 0x11d   : > { %v1003_v59 = vpop.f32.mrf.mxu0  ;;  %v1131_v60 = vpop.f32.mrf.mxu1 }
 0x11e   : > { %v1582_v61 = vmax.f32 %v1518_v55, 0.0  ;;  %v1614_v62 = vmax.f32 %v1550_v56, 0.0  ;;  %v1448_v63 = vmul.f32 %v2898_v17, %v1003_v59  ;;  %v1480_v0 = vmul.f32 %v2898_v17, %v1131_v60 }
 0x11f   : > { %v1005_v1 = vpop.f32.mrf.mxu0  ;;  %v1133_v2 = vpop.f32.mrf.mxu1 }
 0x120   : > { %v2323_v3 = vpack.c.bf16 %v1582_v61, %v1581_v57  ;;  %v2403_v4 = vpack.c.bf16 %v1614_v62, %v1613_v58  ;;  %v1519_v5 = vadd.f32 %v2904_v21, %v1448_v63  ;;  %v1551_v6 = vadd.f32 %v2904_v21, %v1480_v0 }
 0x121   : > { %v1006_v7 = vpop.f32.mrf.mxu0  ;;  %v1134_v8 = vpop.f32.mrf.mxu1 }
 0x122   : > { %2475 = vst [vmem:[%s2919_s15 + $0x8] sm:$0xff] %v2323_v3   ;;  %2491 = vst [vmem:[%s2919_s15 + $0x88] sm:$0xff] %v2403_v4   ;;  %v1449_v9 = vmul.f32 %v2898_v17, %v1006_v7  ;;  %v1481_v10 = vmul.f32 %v2898_v17, %v1134_v8  ;;  %v1583_v15 = vmax.f32 %v1519_v5, 0.0  ;;  %v1615_v16 = vmax.f32 %v1551_v6, 0.0 }
 0x123   : > { %v1008_v11 = vpop.f32.mrf.mxu0  ;;  %v1136_v12 = vpop.f32.mrf.mxu1 }
 0x124   : > { %v1520_v13 = vadd.f32 %v2904_v21, %v1449_v9  ;;  %v1552_v14 = vadd.f32 %v2904_v21, %v1481_v10 }
 0x125   : > { %v1011_v18 = vpop.f32.mrf.mxu0  ;;  %v1139_v19 = vpop.f32.mrf.mxu1 }
 0x126   : > { %v1584_v20 = vmax.f32 %v1520_v13, 0.0  ;;  %v1616_v22 = vmax.f32 %v1552_v14, 0.0  ;;  %v1450_v23 = vmul.f32 %v2898_v17, %v1011_v18  ;;  %v1482_v24 = vmul.f32 %v2898_v17, %v1139_v19 }
 0x127   : > { %v1013_v25 = vpop.f32.mrf.mxu0  ;;  %v1141_v26 = vpop.f32.mrf.mxu1 }
 0x128   : > { %v2328_v27 = vpack.c.bf16 %v1584_v20, %v1583_v15  ;;  %v2408_v28 = vpack.c.bf16 %v1616_v22, %v1615_v16  ;;  %v1521_v29 = vadd.f32 %v2904_v21, %v1450_v23  ;;  %v1553_v30 = vadd.f32 %v2904_v21, %v1482_v24 }
 0x129   : > { %v1014_v31 = vpop.f32.mrf.mxu0  ;;  %v1142_v32 = vpop.f32.mrf.mxu1 }
 0x12a   : > { %2476 = vst [vmem:[%s2919_s15 + $0x10] sm:$0xff] %v2328_v27   ;;  %2492 = vst [vmem:[%s2919_s15 + $0x90] sm:$0xff] %v2408_v28   ;;  %v1451_v33 = vmul.f32 %v2898_v17, %v1014_v31  ;;  %v1483_v34 = vmul.f32 %v2898_v17, %v1142_v32  ;;  %v1585_v39 = vmax.f32 %v1521_v29, 0.0  ;;  %v1617_v40 = vmax.f32 %v1553_v30, 0.0 }
 0x12b   : > { %v1016_v35 = vpop.f32.mrf.mxu0  ;;  %v1144_v36 = vpop.f32.mrf.mxu1 }
 0x12c   : > { %v1522_v37 = vadd.f32 %v2904_v21, %v1451_v33  ;;  %v1554_v38 = vadd.f32 %v2904_v21, %v1483_v34 }
 0x12d   : > { %v1019_v41 = vpop.f32.mrf.mxu0  ;;  %v1147_v42 = vpop.f32.mrf.mxu1 }
 0x12e   : > { %v1586_v43 = vmax.f32 %v1522_v37, 0.0  ;;  %v1618_v44 = vmax.f32 %v1554_v38, 0.0  ;;  %v1452_v45 = vmul.f32 %v2898_v17, %v1019_v41  ;;  %v1484_v46 = vmul.f32 %v2898_v17, %v1147_v42 }
 0x12f   : > { %v1021_v47 = vpop.f32.mrf.mxu0  ;;  %v1149_v48 = vpop.f32.mrf.mxu1 }
 0x130   : > { %v2333_v49 = vpack.c.bf16 %v1586_v43, %v1585_v39  ;;  %v2413_v50 = vpack.c.bf16 %v1618_v44, %v1617_v40  ;;  %v1523_v51 = vadd.f32 %v2904_v21, %v1452_v45  ;;  %v1555_v52 = vadd.f32 %v2904_v21, %v1484_v46 }
 0x131   : > { %v1022_v53 = vpop.f32.mrf.mxu0  ;;  %v1150_v54 = vpop.f32.mrf.mxu1 }
 0x132   : > { %2477 = vst [vmem:[%s2919_s15 + $0x18] sm:$0xff] %v2333_v49   ;;  %2493 = vst [vmem:[%s2919_s15 + $0x98] sm:$0xff] %v2413_v50   ;;  %v1453_v55 = vmul.f32 %v2898_v17, %v1022_v53  ;;  %v1485_v56 = vmul.f32 %v2898_v17, %v1150_v54  ;;  %v1587_v61 = vmax.f32 %v1523_v51, 0.0  ;;  %v1619_v62 = vmax.f32 %v1555_v52, 0.0 }
 0x133   : > { %v1024_v57 = vpop.f32.mrf.mxu0  ;;  %v1152_v58 = vpop.f32.mrf.mxu1 }
 0x134   : > { %v1524_v59 = vadd.f32 %v2904_v21, %v1453_v55  ;;  %v1556_v60 = vadd.f32 %v2904_v21, %v1485_v56 }
 0x135   : > { %v1027_v63 = vpop.f32.mrf.mxu0  ;;  %v1155_v0 = vpop.f32.mrf.mxu1 }
 0x136   : > { %v1588_v1 = vmax.f32 %v1524_v59, 0.0  ;;  %v1620_v2 = vmax.f32 %v1556_v60, 0.0  ;;  %v1454_v3 = vmul.f32 %v2898_v17, %v1027_v63  ;;  %v1486_v4 = vmul.f32 %v2898_v17, %v1155_v0 }
 0x137   : > { %v1029_v5 = vpop.f32.mrf.mxu0  ;;  %v1157_v6 = vpop.f32.mrf.mxu1 }
 0x138   : > { %v2338_v7 = vpack.c.bf16 %v1588_v1, %v1587_v61  ;;  %v2418_v8 = vpack.c.bf16 %v1620_v2, %v1619_v62  ;;  %v1525_v9 = vadd.f32 %v2904_v21, %v1454_v3  ;;  %v1557_v10 = vadd.f32 %v2904_v21, %v1486_v4 }
 0x139   : > { %v1030_v11 = vpop.f32.mrf.mxu0  ;;  %v1158_v12 = vpop.f32.mrf.mxu1 }
 0x13a   : > { %2478 = vst [vmem:[%s2919_s15 + $0x20] sm:$0xff] %v2338_v7   ;;  %2494 = vst [vmem:[%s2919_s15 + $0xa0] sm:$0xff] %v2418_v8   ;;  %v1455_v13 = vmul.f32 %v2898_v17, %v1030_v11  ;;  %v1487_v14 = vmul.f32 %v2898_v17, %v1158_v12  ;;  %v1589_v20 = vmax.f32 %v1525_v9, 0.0  ;;  %v1621_v22 = vmax.f32 %v1557_v10, 0.0 }
 0x13b   : > { %v1032_v15 = vpop.f32.mrf.mxu0  ;;  %v1160_v16 = vpop.f32.mrf.mxu1 }
 0x13c   : > { %v1526_v18 = vadd.f32 %v2904_v21, %v1455_v13  ;;  %v1558_v19 = vadd.f32 %v2904_v21, %v1487_v14 }
 0x13d   : > { %v1035_v23 = vpop.f32.mrf.mxu0  ;;  %v1163_v24 = vpop.f32.mrf.mxu1 }
 0x13e   : > { %v1590_v25 = vmax.f32 %v1526_v18, 0.0  ;;  %v1622_v26 = vmax.f32 %v1558_v19, 0.0  ;;  %v1456_v27 = vmul.f32 %v2898_v17, %v1035_v23  ;;  %v1488_v28 = vmul.f32 %v2898_v17, %v1163_v24 }
 0x13f   : > { %v1037_v29 = vpop.f32.mrf.mxu0  ;;  %v1165_v30 = vpop.f32.mrf.mxu1 }
 0x140   : > { %v2343_v31 = vpack.c.bf16 %v1590_v25, %v1589_v20  ;;  %v2423_v32 = vpack.c.bf16 %v1622_v26, %v1621_v22  ;;  %v1527_v33 = vadd.f32 %v2904_v21, %v1456_v27  ;;  %v1559_v34 = vadd.f32 %v2904_v21, %v1488_v28 }
 0x141   : > { %v1038_v35 = vpop.f32.mrf.mxu0  ;;  %v1166_v36 = vpop.f32.mrf.mxu1 }
 0x142   : > { %2479 = vst [vmem:[%s2919_s15 + $0x28] sm:$0xff] %v2343_v31   ;;  %2495 = vst [vmem:[%s2919_s15 + $0xa8] sm:$0xff] %v2423_v32   ;;  %v1457_v37 = vmul.f32 %v2898_v17, %v1038_v35  ;;  %v1489_v38 = vmul.f32 %v2898_v17, %v1166_v36  ;;  %v1591_v43 = vmax.f32 %v1527_v33, 0.0  ;;  %v1623_v44 = vmax.f32 %v1559_v34, 0.0 }
 0x143   : > { %v1040_v39 = vpop.f32.mrf.mxu0  ;;  %v1168_v40 = vpop.f32.mrf.mxu1 }
 0x144   : > { %v1528_v41 = vadd.f32 %v2904_v21, %v1457_v37  ;;  %v1560_v42 = vadd.f32 %v2904_v21, %v1489_v38 }
 0x145   : > { %v1043_v45 = vpop.f32.mrf.mxu0  ;;  %v1171_v46 = vpop.f32.mrf.mxu1 }
 0x146   : > { %v1592_v47 = vmax.f32 %v1528_v41, 0.0  ;;  %v1624_v48 = vmax.f32 %v1560_v42, 0.0  ;;  %v1458_v49 = vmul.f32 %v2898_v17, %v1043_v45  ;;  %v1490_v50 = vmul.f32 %v2898_v17, %v1171_v46 }
 0x147   : > { %v1045_v51 = vpop.f32.mrf.mxu0  ;;  %v1173_v52 = vpop.f32.mrf.mxu1 }
 0x148   : > { %v2348_v53 = vpack.c.bf16 %v1592_v47, %v1591_v43  ;;  %v2428_v54 = vpack.c.bf16 %v1624_v48, %v1623_v44  ;;  %v1529_v55 = vadd.f32 %v2904_v21, %v1458_v49  ;;  %v1561_v56 = vadd.f32 %v2904_v21, %v1490_v50 }
 0x149   : > { %v1046_v57 = vpop.f32.mrf.mxu0  ;;  %v1174_v58 = vpop.f32.mrf.mxu1 }
 0x14a   : > { %2480 = vst [vmem:[%s2919_s15 + $0x30] sm:$0xff] %v2348_v53   ;;  %2496 = vst [vmem:[%s2919_s15 + $0xb0] sm:$0xff] %v2428_v54   ;;  %v1459_v59 = vmul.f32 %v2898_v17, %v1046_v57  ;;  %v1491_v60 = vmul.f32 %v2898_v17, %v1174_v58  ;;  %v1593_v1 = vmax.f32 %v1529_v55, 0.0  ;;  %v1625_v2 = vmax.f32 %v1561_v56, 0.0 }
 0x14b   : > { %v1048_v61 = vpop.f32.mrf.mxu0  ;;  %v1176_v62 = vpop.f32.mrf.mxu1 }
 0x14c   : > { %v1530_v63 = vadd.f32 %v2904_v21, %v1459_v59  ;;  %v1562_v0 = vadd.f32 %v2904_v21, %v1491_v60 }
 0x14d   : > { %v1051_v3 = vpop.f32.mrf.mxu0  ;;  %v1179_v4 = vpop.f32.mrf.mxu1 }
 0x14e   : > { %v1594_v5 = vmax.f32 %v1530_v63, 0.0  ;;  %v1626_v6 = vmax.f32 %v1562_v0, 0.0  ;;  %v1460_v7 = vmul.f32 %v2898_v17, %v1051_v3  ;;  %v1492_v8 = vmul.f32 %v2898_v17, %v1179_v4 }
 0x14f   : > { %v1053_v9 = vpop.f32.mrf.mxu0  ;;  %v1181_v10 = vpop.f32.mrf.mxu1 }
 0x150   : > { %v2353_v11 = vpack.c.bf16 %v1594_v5, %v1593_v1  ;;  %v2433_v12 = vpack.c.bf16 %v1626_v6, %v1625_v2  ;;  %v1531_v13 = vadd.f32 %v2904_v21, %v1460_v7  ;;  %v1563_v14 = vadd.f32 %v2904_v21, %v1492_v8 }
 0x151   : > { %v1054_v15 = vpop.f32.mrf.mxu0  ;;  %v1182_v16 = vpop.f32.mrf.mxu1 }
 0x152   : > { %2481 = vst [vmem:[%s2919_s15 + $0x38] sm:$0xff] %v2353_v11   ;;  %2497 = vst [vmem:[%s2919_s15 + $0xb8] sm:$0xff] %v2433_v12   ;;  %v1461_v18 = vmul.f32 %v2898_v17, %v1054_v15  ;;  %v1493_v19 = vmul.f32 %v2898_v17, %v1182_v16  ;;  %v1595_v25 = vmax.f32 %v1531_v13, 0.0  ;;  %v1627_v26 = vmax.f32 %v1563_v14, 0.0 }
 0x153   : > { %v1056_v20 = vpop.f32.mrf.mxu0  ;;  %v1184_v22 = vpop.f32.mrf.mxu1 }
 0x154   : > { %v1532_v23 = vadd.f32 %v2904_v21, %v1461_v18  ;;  %v1564_v24 = vadd.f32 %v2904_v21, %v1493_v19 }
 0x155   : > { %v1059_v27 = vpop.f32.mrf.mxu0  ;;  %v1187_v28 = vpop.f32.mrf.mxu1 }
 0x156   : > { %v1596_v29 = vmax.f32 %v1532_v23, 0.0  ;;  %v1628_v30 = vmax.f32 %v1564_v24, 0.0  ;;  %v1462_v31 = vmul.f32 %v2898_v17, %v1059_v27  ;;  %v1494_v32 = vmul.f32 %v2898_v17, %v1187_v28 }
 0x157   : > { %v1061_v33 = vpop.f32.mrf.mxu0  ;;  %v1189_v34 = vpop.f32.mrf.mxu1 }
 0x158   : > { %v2358_v35 = vpack.c.bf16 %v1596_v29, %v1595_v25  ;;  %v2438_v36 = vpack.c.bf16 %v1628_v30, %v1627_v26  ;;  %v1533_v37 = vadd.f32 %v2904_v21, %v1462_v31  ;;  %v1565_v38 = vadd.f32 %v2904_v21, %v1494_v32 }
 0x159   : > { %v1062_v39 = vpop.f32.mrf.mxu0  ;;  %v1190_v40 = vpop.f32.mrf.mxu1 }
 0x15a   : > { %2482 = vst [vmem:[%s2919_s15 + $0x40] sm:$0xff] %v2358_v35   ;;  %2498 = vst [vmem:[%s2919_s15 + $0xc0] sm:$0xff] %v2438_v36   ;;  %v1463_v41 = vmul.f32 %v2898_v17, %v1062_v39  ;;  %v1495_v42 = vmul.f32 %v2898_v17, %v1190_v40  ;;  %v1597_v47 = vmax.f32 %v1533_v37, 0.0  ;;  %v1629_v48 = vmax.f32 %v1565_v38, 0.0 }
 0x15b   : > { %v1064_v43 = vpop.f32.mrf.mxu0  ;;  %v1192_v44 = vpop.f32.mrf.mxu1 }
 0x15c   : > { %v1534_v45 = vadd.f32 %v2904_v21, %v1463_v41  ;;  %v1566_v46 = vadd.f32 %v2904_v21, %v1495_v42 }
 0x15d   : > { %v1067_v49 = vpop.f32.mrf.mxu0  ;;  %v1195_v50 = vpop.f32.mrf.mxu1 }
 0x15e   : > { %v1598_v51 = vmax.f32 %v1534_v45, 0.0  ;;  %v1630_v52 = vmax.f32 %v1566_v46, 0.0  ;;  %v1464_v53 = vmul.f32 %v2898_v17, %v1067_v49  ;;  %v1496_v54 = vmul.f32 %v2898_v17, %v1195_v50 }
 0x15f   : > { %v1069_v55 = vpop.f32.mrf.mxu0  ;;  %v1197_v56 = vpop.f32.mrf.mxu1 }
 0x160   : > { %v2363_v57 = vpack.c.bf16 %v1598_v51, %v1597_v47  ;;  %v2443_v58 = vpack.c.bf16 %v1630_v52, %v1629_v48  ;;  %v1535_v59 = vadd.f32 %v2904_v21, %v1464_v53  ;;  %v1567_v60 = vadd.f32 %v2904_v21, %v1496_v54 }
 0x161   : > { %v1070_v61 = vpop.f32.mrf.mxu0  ;;  %v1198_v62 = vpop.f32.mrf.mxu1 }
 0x162   : > { %2483 = vst [vmem:[%s2919_s15 + $0x48] sm:$0xff] %v2363_v57   ;;  %2499 = vst [vmem:[%s2919_s15 + $0xc8] sm:$0xff] %v2443_v58   ;;  %v1465_v63 = vmul.f32 %v2898_v17, %v1070_v61  ;;  %v1497_v0 = vmul.f32 %v2898_v17, %v1198_v62  ;;  %v1599_v5 = vmax.f32 %v1535_v59, 0.0  ;;  %v1631_v6 = vmax.f32 %v1567_v60, 0.0 }
 0x163   : > { %v1072_v1 = vpop.f32.mrf.mxu0  ;;  %v1200_v2 = vpop.f32.mrf.mxu1 }
 0x164   : > { %v1536_v3 = vadd.f32 %v2904_v21, %v1465_v63  ;;  %v1568_v4 = vadd.f32 %v2904_v21, %v1497_v0 }
 0x165   : > { %v1075_v7 = vpop.f32.mrf.mxu0  ;;  %v1203_v8 = vpop.f32.mrf.mxu1 }
 0x166   : > { %v1600_v9 = vmax.f32 %v1536_v3, 0.0  ;;  %v1632_v10 = vmax.f32 %v1568_v4, 0.0  ;;  %v1466_v11 = vmul.f32 %v2898_v17, %v1075_v7  ;;  %v1498_v12 = vmul.f32 %v2898_v17, %v1203_v8 }
 0x167   : > { %v1077_v13 = vpop.f32.mrf.mxu0  ;;  %v1205_v14 = vpop.f32.mrf.mxu1 }
 0x168   : > { %v2368_v15 = vpack.c.bf16 %v1600_v9, %v1599_v5  ;;  %v2448_v16 = vpack.c.bf16 %v1632_v10, %v1631_v6  ;;  %v1537_v18 = vadd.f32 %v2904_v21, %v1466_v11  ;;  %v1569_v19 = vadd.f32 %v2904_v21, %v1498_v12 }
 0x169   : > { %v1078_v20 = vpop.f32.mrf.mxu0  ;;  %v1206_v22 = vpop.f32.mrf.mxu1 }
 0x16a   : > { %2484 = vst [vmem:[%s2919_s15 + $0x50] sm:$0xff] %v2368_v15   ;;  %2500 = vst [vmem:[%s2919_s15 + $0xd0] sm:$0xff] %v2448_v16   ;;  %v1467_v23 = vmul.f32 %v2898_v17, %v1078_v20  ;;  %v1499_v24 = vmul.f32 %v2898_v17, %v1206_v22  ;;  %v1601_v29 = vmax.f32 %v1537_v18, 0.0  ;;  %v1633_v30 = vmax.f32 %v1569_v19, 0.0 }
 0x16b   : > { %v1080_v25 = vpop.f32.mrf.mxu0  ;;  %v1208_v26 = vpop.f32.mrf.mxu1 }
 0x16c   : > { %v1538_v27 = vadd.f32 %v2904_v21, %v1467_v23  ;;  %v1570_v28 = vadd.f32 %v2904_v21, %v1499_v24 }
 0x16d   : > { %v1083_v31 = vpop.f32.mrf.mxu0  ;;  %v1211_v32 = vpop.f32.mrf.mxu1 }
 0x16e   : > { %v1602_v33 = vmax.f32 %v1538_v27, 0.0  ;;  %v1634_v34 = vmax.f32 %v1570_v28, 0.0  ;;  %v1468_v35 = vmul.f32 %v2898_v17, %v1083_v31  ;;  %v1500_v36 = vmul.f32 %v2898_v17, %v1211_v32 }
 0x16f   : > { %v1085_v37 = vpop.f32.mrf.mxu0  ;;  %v1213_v38 = vpop.f32.mrf.mxu1 }
 0x170   : > { %v2373_v39 = vpack.c.bf16 %v1602_v33, %v1601_v29  ;;  %v2453_v40 = vpack.c.bf16 %v1634_v34, %v1633_v30  ;;  %v1539_v41 = vadd.f32 %v2904_v21, %v1468_v35  ;;  %v1571_v42 = vadd.f32 %v2904_v21, %v1500_v36 }
 0x171   : > { %v1086_v43 = vpop.f32.mrf.mxu0  ;;  %v1214_v44 = vpop.f32.mrf.mxu1 }
 0x172   : > { %2485 = vst [vmem:[%s2919_s15 + $0x58] sm:$0xff] %v2373_v39   ;;  %2501 = vst [vmem:[%s2919_s15 + $0xd8] sm:$0xff] %v2453_v40   ;;  %v1469_v45 = vmul.f32 %v2898_v17, %v1086_v43  ;;  %v1501_v46 = vmul.f32 %v2898_v17, %v1214_v44  ;;  %v1603_v51 = vmax.f32 %v1539_v41, 0.0  ;;  %v1635_v52 = vmax.f32 %v1571_v42, 0.0 }
 0x173   : > { %v1088_v47 = vpop.f32.mrf.mxu0  ;;  %v1216_v48 = vpop.f32.mrf.mxu1 }
 0x174   : > { %v1540_v49 = vadd.f32 %v2904_v21, %v1469_v45  ;;  %v1572_v50 = vadd.f32 %v2904_v21, %v1501_v46 }
 0x175   : > { %v1091_v53 = vpop.f32.mrf.mxu0  ;;  %v1219_v54 = vpop.f32.mrf.mxu1 }
 0x176   : > { %v1604_v55 = vmax.f32 %v1540_v49, 0.0  ;;  %v1636_v56 = vmax.f32 %v1572_v50, 0.0  ;;  %v1470_v57 = vmul.f32 %v2898_v17, %v1091_v53  ;;  %v1502_v58 = vmul.f32 %v2898_v17, %v1219_v54 }
 0x177   : > { %v1093_v59 = vpop.f32.mrf.mxu0  ;;  %v1221_v60 = vpop.f32.mrf.mxu1 }
 0x178   : > { %v2378_v61 = vpack.c.bf16 %v1604_v55, %v1603_v51  ;;  %v2458_v62 = vpack.c.bf16 %v1636_v56, %v1635_v52  ;;  %v1541_v63 = vadd.f32 %v2904_v21, %v1470_v57  ;;  %v1573_v0 = vadd.f32 %v2904_v21, %v1502_v58 }
 0x179   : > { %v1094_v1 = vpop.f32.mrf.mxu0  ;;  %v1222_v2 = vpop.f32.mrf.mxu1 }
 0x17a   : > { %2486 = vst [vmem:[%s2919_s15 + $0x60] sm:$0xff] %v2378_v61   ;;  %2502 = vst [vmem:[%s2919_s15 + $0xe0] sm:$0xff] %v2458_v62   ;;  %v1471_v3 = vmul.f32 %v2898_v17, %v1094_v1  ;;  %v1503_v4 = vmul.f32 %v2898_v17, %v1222_v2  ;;  %v1605_v9 = vmax.f32 %v1541_v63, 0.0  ;;  %v1637_v10 = vmax.f32 %v1573_v0, 0.0 }
 0x17b   : > { %v1096_v5 = vpop.f32.mrf.mxu0  ;;  %v1224_v6 = vpop.f32.mrf.mxu1 }
 0x17c   : > { %v1542_v7 = vadd.f32 %v2904_v21, %v1471_v3  ;;  %v1574_v8 = vadd.f32 %v2904_v21, %v1503_v4 }
 0x17d   : > { %v1099_v11 = vpop.f32.mrf.mxu0  ;;  %v1227_v12 = vpop.f32.mrf.mxu1 }
 0x17e   : > { %v1606_v13 = vmax.f32 %v1542_v7, 0.0  ;;  %v1638_v14 = vmax.f32 %v1574_v8, 0.0  ;;  %v1472_v15 = vmul.f32 %v2898_v17, %v1099_v11  ;;  %v1504_v16 = vmul.f32 %v2898_v17, %v1227_v12 }
 0x17f   : > { %v1101_v18 = vpop.f32.mrf.mxu0  ;;  %v1229_v19 = vpop.f32.mrf.mxu1 }
 0x180   : > { %v2383_v20 = vpack.c.bf16 %v1606_v13, %v1605_v9  ;;  %v2463_v22 = vpack.c.bf16 %v1638_v14, %v1637_v10  ;;  %v1543_v23 = vadd.f32 %v2904_v21, %v1472_v15  ;;  %v1575_v24 = vadd.f32 %v2904_v21, %v1504_v16 }
 0x181   : > { %v1102_v25 = vpop.f32.mrf.mxu0  ;;  %v1230_v26 = vpop.f32.mrf.mxu1 }
 0x182   : > { %2487 = vst [vmem:[%s2919_s15 + $0x68] sm:$0xff] %v2383_v20   ;;  %2503 = vst [vmem:[%s2919_s15 + $0xe8] sm:$0xff] %v2463_v22   ;;  %v1473_v27 = vmul.f32 %v2898_v17, %v1102_v25  ;;  %v1505_v28 = vmul.f32 %v2898_v17, %v1230_v26  ;;  %v1607_v33 = vmax.f32 %v1543_v23, 0.0  ;;  %v1639_v34 = vmax.f32 %v1575_v24, 0.0 }
 0x183   : > { %v1104_v29 = vpop.f32.mrf.mxu0  ;;  %v1232_v30 = vpop.f32.mrf.mxu1 }
 0x184   : > { %v1544_v31 = vadd.f32 %v2904_v21, %v1473_v27  ;;  %v1576_v32 = vadd.f32 %v2904_v21, %v1505_v28 }
 0x185   : > { %v1107_v35 = vpop.f32.mrf.mxu0  ;;  %v1235_v36 = vpop.f32.mrf.mxu1 }
 0x186   : > { %v1608_v37 = vmax.f32 %v1544_v31, 0.0  ;;  %v1640_v38 = vmax.f32 %v1576_v32, 0.0  ;;  %v1474_v39 = vmul.f32 %v2898_v17, %v1107_v35  ;;  %v1506_v40 = vmul.f32 %v2898_v17, %v1235_v36 }
 0x187   : > { %v1109_v41 = vpop.f32.mrf.mxu0  ;;  %v1237_v42 = vpop.f32.mrf.mxu1 }
 0x188   : > { %v2388_v43 = vpack.c.bf16 %v1608_v37, %v1607_v33  ;;  %v2468_v44 = vpack.c.bf16 %v1640_v38, %v1639_v34  ;;  %v1545_v47 = vadd.f32 %v2904_v21, %v1474_v39  ;;  %v1577_v48 = vadd.f32 %v2904_v21, %v1506_v40 }
 0x189   : > { %v1110_v45 = vpop.f32.mrf.mxu0  ;;  %v1238_v46 = vpop.f32.mrf.mxu1 }
 0x18a   : > { %2488 = vst [vmem:[%s2919_s15 + $0x70] sm:$0xff] %v2388_v43   ;;  %2504 = vst [vmem:[%s2919_s15 + $0xf0] sm:$0xff] %v2468_v44   ;;  %v1475_v49 = vmul.f32 %v2898_v17, %v1110_v45  ;;  %v1507_v50 = vmul.f32 %v2898_v17, %v1238_v46  ;;  %v1609_v55 = vmax.f32 %v1545_v47, 0.0  ;;  %v1641_v56 = vmax.f32 %v1577_v48, 0.0 }
 0x18b   : > { %v1112_v51 = vpop.f32.mrf.mxu0  ;;  %v1240_v52 = vpop.f32.mrf.mxu1 }
 0x18c   : > { %v1546_v53 = vadd.f32 %v2904_v21, %v1475_v49  ;;  %v1578_v54 = vadd.f32 %v2904_v21, %v1507_v50 }
 0x18e   : > { %v1610_v57 = vmax.f32 %v1546_v53, 0.0  ;;  %v1642_v58 = vmax.f32 %v1578_v54, 0.0 }
 0x190   : > { %v2393_v59 = vpack.c.bf16 %v1610_v57, %v1609_v55  ;;  %v2473_v60 = vpack.c.bf16 %v1642_v58, %v1641_v56 }
 0x192   : > { %2489 = vst [vmem:[%s2919_s15 + $0x78] sm:$0xff] %v2393_v59   ;;  %2505 = vst [vmem:[%s2919_s15 + $0xf8] sm:$0xff] %v2473_v60  }
 0x193 PF: > { %s14_s17 = sadd.s32 1, %s2697_s17   ;;  %s3085_s15 = smov %s2693_s16 }
 0x194   : > { %p11_p5 = scmp.ge.s32.totalorder %s14_s17, 10   ;;  %s3086_s16 = smov %s3088_s18 }
 0x196   :  { %13 = sbr.rel (!%p11_p5) target bundleno = 2 (0x2), region = 83 }

</bundles_post_ra>
